<compile_context>
chip_gen: v7x
topology: tpu7x:2x2x1
jax: 0.10.0
libtpu: 0.0.40
codegen_flags: <defaults>
</compile_context>

<pallas_src>
import functools

import jax
import jax.numpy as jnp
from jax.experimental import pallas as pl
from jax.experimental.pallas import tpu as pltpu

EPS = 1e-6


def _gem_sed_kernel(F_total, f_inner, gem_dtype,
                    p_ref, x_ref, w1_ref, b1_ref, wac_ref, bac_ref,
                    att_ref, cla_ref, logit_ref,
                    acc_ref):
    """One (batch-tile, F-tile) grid step.

    x_ref:   (TB, C, TF, T)  -- native PyTorch layout, no host-side transpose of x.
    acc_ref: (TB, C, T)      -- running sum over F of clamp(x, eps)^p (VMEM scratch).
    Outputs (att / cla / logit) are written only on the last F step (accumulator finalize).
    """
    fi = pl.program_id(1)
    p = p_ref[0]                                                   # learnable GeM power

    TB, C, TF, T = x_ref.shape
    n_cls = att_ref.shape[1]
    n_chunks = TF // f_inner

    @pl.when(fi == 0)
    def _init():
        acc_ref[...] = jnp.zeros_like(acc_ref)

    # ---- GeM partial: stream clamp(x, eps)^p over F in sublane-aligned chunks ----
    # Streaming keeps the live exp/log temporary at (TB, C, f_inner, T) instead of the full
    # (TB, C, TF, T) tile; the sum over the chunk's F rows is a sublane (XLU) reduce.
    def gem_chunk(ci, part):
        start = pl.multiple_of(ci * f_inner, f_inner)
        xs = x_ref[:, :, pl.ds(start, f_inner), :]                 # (TB, C, f_inner, T)
        if gem_dtype != jnp.float32:
            xs = xs.astype(gem_dtype)                              # v6e/v7x: bf16 EUP path
        xp = jnp.exp(jnp.log(jnp.maximum(xs, jnp.asarray(EPS, xs.dtype)))
                     * p.astype(xs.dtype))                         # EUP exp/log
        return part + jnp.sum(xp.astype(jnp.float32), axis=2)      # f32 accumulation

    part = jax.lax.fori_loop(0, n_chunks, gem_chunk,
                             jnp.zeros((TB, C, T), jnp.float32), unroll=True)
    acc_ref[...] += part

    @pl.when(fi == pl.num_programs(1) - 1)
    def _finalize():
        inv_p = 1.0 / p
        inv_f = 1.0 / F_total
        neg_inf = jnp.float32(-jnp.inf)
        tcol = jax.lax.broadcasted_iota(jnp.int32, (1, T), 1)      # lane iota only
        first = tcol == 0
        last = tcol == T - 1

        for b in range(TB):                                        # small static unroll
            gem = jnp.exp(jnp.log(acc_ref[b] * inv_f) * inv_p)     # (C, T) GeM mean^(1/p)

            # ---- max_pool1d + avg_pool1d (k=3, s=1, pad=1) along T ----
            gl = jnp.concatenate([gem[:, :1], gem[:, :T - 1]], axis=1)   # gl[:, t] = gem[:, t-1]
            gr = jnp.concatenate([gem[:, 1:], gem[:, T - 1:]], axis=1)   # gr[:, t] = gem[:, t+1]
            x1 = jnp.maximum(jnp.maximum(gem, jnp.where(first, neg_inf, gl)),
                             jnp.where(last, neg_inf, gr))
            # avg_pool1d pads with zeros and always divides by 3 (count_include_pad=True)
            x2 = (gem + jnp.where(first, 0.0, gl) + jnp.where(last, 0.0, gr)) * (1.0 / 3.0)
            h = x1 + x2                                            # (C, T)

            # ---- conv1x1 (Conv1d k=1, BatchNorm folded, eval mode) + ReLU ----
            h = jnp.maximum(
                jnp.dot(w1_ref[...], h, preferred_element_type=jnp.float32) + b1_ref[...],
                0.0)

            # ---- stacked att / cla 1x1 convs: one MXU pass ----
            ac = jnp.dot(wac_ref[...], h, preferred_element_type=jnp.float32) + bac_ref[...]
            a = jnp.tanh(ac[:n_cls])                               # (Ncls, T)
            cla = ac[n_cls:]                                       # (Ncls, T)

            # ---- softmax over T (tanh is bounded -> no max-subtraction needed) ----
            e = jnp.exp(a)
            denom = jnp.sum(e, axis=-1, keepdims=True)             # (Ncls, 1), XLU lane reduce
            natt = e * pl.reciprocal(denom, approx=True)

            att_ref[b] = natt
            cla_ref[b] = cla
            logit_ref[b] = jnp.sum(natt * cla, axis=-1, keepdims=True)   # (Ncls, 1)


def gem_sed_pooling(x, p, w1f, b1f, wa, ba, wc, bc, *,
                    batch_tile=None, f_tile=None, f_inner=8, gem_dtype=jnp.float32):
    """x: (B, C, F, T) f32. Returns (logit (B,Ncls), norm_att (B,Ncls,T), cla (B,Ncls,T))."""
    B, C, F, T = x.shape
    n_cls = wa.shape[0]

    # Batch tiling: independent -> "parallel" grid axis.  Default splits B in two so dual-TC
    # chips (v7x) get work on both TensorCores.
    if batch_tile is None:
        batch_tile = B // 2 if (B % 2 == 0 and B > 1) else B
    TB = batch_tile
    assert B % TB == 0

    # F tiling: reduction axis (kept last in the grid).  Pick the largest divisor of F that is
    # sublane-aligned (multiple of 8, or F itself) and keeps the double-buffered x tile inside
    # a modest VMEM budget (fits v7x's 64 MiB physical VMEM with room for weights/outputs).
    if f_tile is None:
        row_bytes = TB * C * T * 4
        cap = max(1, (12 << 20) // (2 * row_bytes))
        f_tile = F
        for tf in range(min(F, cap), 0, -1):
            if F % tf == 0 and (tf % 8 == 0 or tf == F):
                f_tile = tf
                break
    TF = f_tile
    assert F % TF == 0
    nb, nf = B // TB, F // TF
    f_inner = min(f_inner, TF)
    assert TF % f_inner == 0

    # Stack the att and cla 1x1-conv weights so the kernel does a single matmul per batch row.
    wac = jnp.concatenate([wa, wc], axis=0)          # (2*Ncls, C)
    bac = jnp.concatenate([ba, bc], axis=0)          # (2*Ncls, 1)

    kernel = functools.partial(_gem_sed_kernel, F, f_inner, gem_dtype)

    # Size the scoped VMEM limit from the actual buffer sum (with headroom).
    vmem_bytes = (2 * TB * C * TF * T                          # x (double-buffered)
                  + 2 * (C * C + C + 2 * n_cls * C + 2 * n_cls)  # weights / biases
                  + 2 * TB * n_cls * (2 * T + 1)               # att / cla / logit blocks
                  + TB * C * T) * 4                            # acc scratch
    vmem_limit = min(max(int(1.5 * vmem_bytes) + (2 << 20), 32 << 20), 56 << 20)

    grid_spec = pltpu.PrefetchScalarGridSpec(
        num_scalar_prefetch=0,
        grid=(nb, nf),
        in_specs=[
            pl.BlockSpec(memory_space=pltpu.MemorySpace.SMEM),             # p (scalar)
            pl.BlockSpec((TB, C, TF, T), lambda bi, fi: (bi, 0, fi, 0)),   # x, native layout
            # Weights/biases: constant index maps -> fetched once, stay resident.
            pl.BlockSpec((C, C), lambda bi, fi: (0, 0)),                   # conv1x1 W (BN folded)
            pl.BlockSpec((C, 1), lambda bi, fi: (0, 0)),                   # conv1x1 b (BN folded)
            pl.BlockSpec((2 * n_cls, C), lambda bi, fi: (0, 0)),           # stacked att/cla W
            pl.BlockSpec((2 * n_cls, 1), lambda bi, fi: (0, 0)),           # stacked att/cla b
        ],
        out_specs=(
            # Last two block dims equal the full array dims -> valid for any TB.
            pl.BlockSpec((TB, n_cls, T), lambda bi, fi: (bi, 0, 0)),       # norm_att
            pl.BlockSpec((TB, n_cls, T), lambda bi, fi: (bi, 0, 0)),       # cla
            pl.BlockSpec((TB, n_cls, 1), lambda bi, fi: (bi, 0, 0)),       # logit
        ),
        scratch_shapes=[pltpu.VMEM((TB, C, T), jnp.float32)],              # GeM sum accumulator
    )
    out_shape = (
        jax.ShapeDtypeStruct((B, n_cls, T), jnp.float32),
        jax.ShapeDtypeStruct((B, n_cls, T), jnp.float32),
        jax.ShapeDtypeStruct((B, n_cls, 1), jnp.float32),
    )
    norm_att, cla, logit3 = pl.pallas_call(
        kernel,
        out_shape=out_shape,
        grid_spec=grid_spec,
        compiler_params=pltpu.CompilerParams(
            # batch tiles independent -> parallel (megacore); F tiles accumulate -> arbitrary.
            dimension_semantics=("parallel", "arbitrary"),
            vmem_limit_bytes=vmem_limit),
    )(p, x, w1f, b1f, wac, bac)

    return logit3[..., 0], norm_att, cla


def reference(x, p_val, w1f, b1f, wa, ba, wc, bc):
    """Pure-JAX reference. b1f/ba/bc have shape (channels, 1)."""
    g = jnp.mean(jnp.maximum(x, EPS) ** p_val, axis=2) ** (1.0 / p_val)       # (B, C, T)
    gm = jnp.pad(g, ((0, 0), (0, 0), (1, 1)), constant_values=-jnp.inf)
    x1 = jnp.maximum(jnp.maximum(gm[..., :-2], gm[..., 1:-1]), gm[..., 2:])
    ga = jnp.pad(g, ((0, 0), (0, 0), (1, 1)))
    x2 = (ga[..., :-2] + ga[..., 1:-1] + ga[..., 2:]) / 3.0
    h = x1 + x2
    h = jnp.maximum(jnp.einsum("oc,bct->bot", w1f, h) + b1f[None], 0.0)
    a = jnp.tanh(jnp.einsum("oc,bct->bot", wa, h) + ba[None])
    natt = jax.nn.softmax(a, axis=-1)
    c = jnp.einsum("oc,bct->bot", wc, h) + bc[None]
    return jnp.sum(natt * c, axis=-1), natt, c


if __name__ == "__main__":
    B, C, F, T, NCLS = 2, 8, 32, 16, 8

    key = jax.random.PRNGKey(0)
    kx, k1, k2, k3, k4, k5, k6 = jax.random.split(key, 7)

    x = jax.random.uniform(kx, (B, C, F, T), jnp.float32)

    # GeM power parameter (nn.Parameter(torch.ones(1) * 3))
    p = jnp.ones((1,), jnp.float32) * 3.0

    # Conv1d(C, C, 1) + BatchNorm1d(C) (eval mode, freshly-initialized running stats)
    w1 = 0.1 * jax.random.normal(k1, (C, C), jnp.float32)
    b1 = 0.1 * jax.random.normal(k2, (C,), jnp.float32)
    gamma, beta = jnp.ones((C,), jnp.float32), jnp.zeros((C,), jnp.float32)
    run_mean, run_var = jnp.zeros((C,), jnp.float32), jnp.ones((C,), jnp.float32)
    bn_eps = 1e-5
    scale = gamma / jnp.sqrt(run_var + bn_eps)
    w1f = scale[:, None] * w1                                    # (C, C)  BN-folded weight
    b1f = (scale * (b1 - run_mean) + beta)[:, None]              # (C, 1)  BN-folded bias

    # att / cla Conv1d(C, NCLS, 1)
    wa = 0.1 * jax.random.normal(k3, (NCLS, C), jnp.float32)
    ba = (0.1 * jax.random.normal(k4, (NCLS,), jnp.float32))[:, None]
    wc = 0.1 * jax.random.normal(k5, (NCLS, C), jnp.float32)
    bc = (0.1 * jax.random.normal(k6, (NCLS,), jnp.float32))[:, None]

    # f_tile=16 -> 2 reduction steps over F; default batch_tile -> 2 parallel batch tiles;
    # f_inner=8 -> the streamed in-kernel GeM loop runs 2 chunks per step.
    logit, norm_att, cla = gem_sed_pooling(x, p, w1f, b1f, wa, ba, wc, bc, f_tile=16)
    jax.block_until_ready((logit, norm_att, cla))

    ref_logit, ref_att, ref_cla = reference(x, 3.0, w1f, b1f, wa, ba, wc, bc)
    assert logit.shape == (B, NCLS) and norm_att.shape == (B, NCLS, T) and cla.shape == (B, NCLS, T)
    assert jnp.allclose(logit, ref_logit, rtol=2e-2, atol=2e-3), "logit mismatch"
    assert jnp.allclose(norm_att, ref_att, rtol=2e-2, atol=2e-3), "norm_att mismatch"
    assert jnp.allclose(cla, ref_cla, rtol=2e-2, atol=2e-3), "cla mismatch"

    print("KERNEL_OK")
</pallas_src>

<mosaic_0001>
module attributes {stable_mosaic.version = 11 : i64} {
  func.func @_gem_sed_kernel(%arg0: i32, %arg1: i32, %arg2: memref<1xf32, #tpu.memory_space<smem>>, %arg3: memref<1x8x16x16xf32, #tpu.memory_space<vmem>>, %arg4: memref<8x8xf32, #tpu.memory_space<vmem>>, %arg5: memref<8x1xf32, #tpu.memory_space<vmem>>, %arg6: memref<16x8xf32, #tpu.memory_space<vmem>>, %arg7: memref<16x1xf32, #tpu.memory_space<vmem>>, %arg8: memref<1x8x16xf32, #tpu.memory_space<vmem>>, %arg9: memref<1x8x16xf32, #tpu.memory_space<vmem>>, %arg10: memref<1x8x1xf32, #tpu.memory_space<vmem>>, %arg11: memref<1x8x16xf32, #tpu.memory_space<vmem>>) attributes {dimension_semantics = [#tpu.dimension_semantics<parallel>, #tpu.dimension_semantics<arbitrary>], iteration_bounds = array<i64: 2, 2>, scalar_prefetch = 0 : i64, scratch_operands = 1 : i64, tpu.core_type = #tpu.core_type<tc>, window_params = [{transform_indices = @transform_0, window_bounds = array<i64: 1>}, {transform_indices = @transform_1, window_bounds = array<i64: 1, 8, 16, 16>}, {pipeline_mode = #tpu.pipeline_mode<synchronous>, transform_indices = @transform_2, window_bounds = array<i64: 8, 8>}, {pipeline_mode = #tpu.pipeline_mode<synchronous>, transform_indices = @transform_3, window_bounds = array<i64: 8, 1>}, {pipeline_mode = #tpu.pipeline_mode<synchronous>, transform_indices = @transform_4, window_bounds = array<i64: 16, 8>}, {pipeline_mode = #tpu.pipeline_mode<synchronous>, transform_indices = @transform_5, window_bounds = array<i64: 16, 1>}, {transform_indices = @transform_6, window_bounds = array<i64: 1, 8, 16>}, {transform_indices = @transform_7, window_bounds = array<i64: 1, 8, 16>}, {transform_indices = @transform_8, window_bounds = array<i64: 1, 8, 1>}]} {
    %c0 = arith.constant 0 : index
    %0 = memref.load %arg2[%c0] : memref<1xf32, #tpu.memory_space<smem>>
    %c0_i32 = arith.constant 0 : i32
    %1 = arith.cmpi eq, %arg1, %c0_i32 : i32
    %2 = arith.extui %1 : i1 to i32
    %c0_i32_0 = arith.constant 0 : i32
    %3 = arith.cmpi ne, %2, %c0_i32_0 : i32
    scf.if %3 {
      %cst_21 = arith.constant 0.000000e+00 : f32
      %35 = vector.broadcast %cst_21 : f32 to vector<1x8x16xf32>
      %c0_22 = arith.constant 0 : index
      %c0_23 = arith.constant 0 : index
      %c0_24 = arith.constant 0 : index
      %36 = vector.load %arg11[%c0_22, %c0_23, %c0_24] : memref<1x8x16xf32, #tpu.memory_space<vmem>>, vector<1x8x16xf32>
      tpu.vector_store %arg11[%c0_22, %c0_23, %c0_24], %35 {strides = array<i32>} : memref<1x8x16xf32, #tpu.memory_space<vmem>>, vector<1x8x16xf32>,
    } else {
    }
    %cst = arith.constant 0.000000e+00 : f32
    %4 = vector.broadcast %cst : f32 to vector<1x8x16xf32>
    %c0_i32_1 = arith.constant 0 : i32
    %c8_i32 = arith.constant 8 : i32
    %5 = arith.muli %c0_i32_1, %c8_i32 : i32
    %6 = tpu.assume_multiple %5, 8 : i32
    %c0_2 = arith.constant 0 : index
    %c0_3 = arith.constant 0 : index
    %7 = arith.index_cast %6 : i32 to index
    %c0_4 = arith.constant 0 : index
    %8 = vector.load %arg3[%c0_2, %c0_3, %7, %c0_4] : memref<1x8x16x16xf32, #tpu.memory_space<vmem>>, vector<1x8x8x16xf32>
    %cst_5 = arith.constant 9.99999997E-7 : f32
    %9 = vector.broadcast %cst_5 : f32 to vector<1x8x8x16xf32>
    %10 = arith.maximumf %8, %9 : vector<1x8x8x16xf32>
    %11 = math.log %10 : vector<1x8x8x16xf32>
    %12 = vector.broadcast %0 : f32 to vector<1x8x8x16xf32>
    %13 = arith.mulf %11, %12 : vector<1x8x8x16xf32>
    %14 = math.exp %13 : vector<1x8x8x16xf32>
    %cst_6 = arith.constant dense<0.000000e+00> : vector<1x8x16xf32>
    %15 = vector.multi_reduction <add>, %14, %cst_6 [2] : vector<1x8x8x16xf32> to vector<1x8x16xf32>
    %16 = arith.addf %4, %15 : vector<1x8x16xf32>
    %c1_i32 = arith.constant 1 : i32
    %c8_i32_7 = arith.constant 8 : i32
    %17 = arith.muli %c1_i32, %c8_i32_7 : i32
    %18 = tpu.assume_multiple %17, 8 : i32
    %c0_8 = arith.constant 0 : index
    %c0_9 = arith.constant 0 : index
    %19 = arith.index_cast %18 : i32 to index
    %c0_10 = arith.constant 0 : index
    %20 = vector.load %arg3[%c0_8, %c0_9, %19, %c0_10] : memref<1x8x16x16xf32, #tpu.memory_space<vmem>>, vector<1x8x8x16xf32>
    %cst_11 = arith.constant 9.99999997E-7 : f32
    %21 = vector.broadcast %cst_11 : f32 to vector<1x8x8x16xf32>
    %22 = arith.maximumf %20, %21 : vector<1x8x8x16xf32>
    %23 = math.log %22 : vector<1x8x8x16xf32>
    %24 = vector.broadcast %0 : f32 to vector<1x8x8x16xf32>
    %25 = arith.mulf %23, %24 : vector<1x8x8x16xf32>
    %26 = math.exp %25 : vector<1x8x8x16xf32>
    %cst_12 = arith.constant dense<0.000000e+00> : vector<1x8x16xf32>
    %27 = vector.multi_reduction <add>, %26, %cst_12 [2] : vector<1x8x8x16xf32> to vector<1x8x16xf32>
    %28 = arith.addf %16, %27 : vector<1x8x16xf32>
    %c2_i32 = arith.constant 2 : i32
    %c0_13 = arith.constant 0 : index
    %c0_14 = arith.constant 0 : index
    %c0_15 = arith.constant 0 : index
    %29 = vector.load %arg11[%c0_13, %c0_14, %c0_15] : memref<1x8x16xf32, #tpu.memory_space<vmem>>, vector<1x8x16xf32>
    %30 = arith.addf %29, %28 : vector<1x8x16xf32>
    %c0_16 = arith.constant 0 : index
    %c0_17 = arith.constant 0 : index
    %c0_18 = arith.constant 0 : index
    %31 = vector.load %arg11[%c0_16, %c0_17, %c0_18] : memref<1x8x16xf32, #tpu.memory_space<vmem>>, vector<1x8x16xf32>
    tpu.vector_store %arg11[%c0_16, %c0_17, %c0_18], %30 {strides = array<i32>} : memref<1x8x16xf32, #tpu.memory_space<vmem>>, vector<1x8x16xf32>,
    %c1_i32_19 = arith.constant 1 : i32
    %32 = arith.cmpi eq, %arg1, %c1_i32_19 : i32
    %33 = arith.extui %32 : i1 to i32
    %c0_i32_20 = arith.constant 0 : i32
    %34 = arith.cmpi ne, %33, %c0_i32_20 : i32
    scf.if %34 {
      %cst_21 = arith.constant 1.000000e+00 : f32
      %35 = arith.divf %cst_21, %0 : f32
      %36 = tpu.iota {dimensions = array<i32: 1>} : vector<1x16xi32>
      %c0_i32_22 = arith.constant 0 : i32
      %37 = vector.broadcast %c0_i32_22 : i32 to vector<1x16xi32>
      %38 = arith.cmpi eq, %36, %37 : vector<1x16xi32>
      %c15_i32 = arith.constant 15 : i32
      %39 = vector.broadcast %c15_i32 : i32 to vector<1x16xi32>
      %40 = arith.cmpi eq, %36, %39 : vector<1x16xi32>
      %c0_23 = arith.constant 0 : index
      %c0_24 = arith.constant 0 : index
      %c0_25 = arith.constant 0 : index
      %41 = vector.load %arg11[%c0_23, %c0_24, %c0_25] : memref<1x8x16xf32, #tpu.memory_space<vmem>>, vector<1x8x16xf32>
      %42 = vector.shape_cast %41 : vector<1x8x16xf32> to vector<8x16xf32>
      %cst_26 = arith.constant 3.125000e-02 : f32
      %43 = vector.broadcast %cst_26 : f32 to vector<8x16xf32>
      %44 = arith.mulf %42, %43 : vector<8x16xf32>
      %45 = math.log %44 : vector<8x16xf32>
      %46 = vector.broadcast %35 : f32 to vector<8x16xf32>
      %47 = arith.mulf %45, %46 : vector<8x16xf32>
      %48 = math.exp %47 : vector<8x16xf32>
      %49 = vector.extract_strided_slice %48 {offsets = [0, 0], sizes = [8, 1], strides = [1, 1]} : vector<8x16xf32> to vector<8x1xf32>
      %50 = vector.extract_strided_slice %48 {offsets = [0, 0], sizes = [8, 15], strides = [1, 1]} : vector<8x16xf32> to vector<8x15xf32>
      %51 = tpu.concatenate %49, %50 in 1 : vector<8x1xf32>, vector<8x15xf32> -> vector<8x16xf32>
      %52 = vector.extract_strided_slice %48 {offsets = [0, 1], sizes = [8, 15], strides = [1, 1]} : vector<8x16xf32> to vector<8x15xf32>
      %53 = vector.extract_strided_slice %48 {offsets = [0, 15], sizes = [8, 1], strides = [1, 1]} : vector<8x16xf32> to vector<8x1xf32>
      %54 = tpu.concatenate %52, %53 in 1 : vector<8x15xf32>, vector<8x1xf32> -> vector<8x16xf32>
      %cst_27 = arith.constant 0xFF800000 : f32
      %55 = vector.shape_cast %38 : vector<1x16xi1> to vector<1x16xi1>
      %56 = vector.broadcast %55 : vector<1x16xi1> to vector<8x16xi1>
      %57 = vector.broadcast %cst_27 : f32 to vector<8x16xf32>
      %58 = arith.select %56, %57, %51 : vector<8x16xi1>, vector<8x16xf32>
      %59 = arith.maximumf %48, %58 : vector<8x16xf32>
      %cst_28 = arith.constant 0xFF800000 : f32
      %60 = vector.shape_cast %40 : vector<1x16xi1> to vector<1x16xi1>
      %61 = vector.broadcast %60 : vector<1x16xi1> to vector<8x16xi1>
      %62 = vector.broadcast %cst_28 : f32 to vector<8x16xf32>
      %63 = arith.select %61, %62, %54 : vector<8x16xi1>, vector<8x16xf32>
      %64 = arith.maximumf %59, %63 : vector<8x16xf32>
      %cst_29 = arith.constant 0.000000e+00 : f32
      %65 = vector.shape_cast %38 : vector<1x16xi1> to vector<1x16xi1>
      %66 = vector.broadcast %65 : vector<1x16xi1> to vector<8x16xi1>
      %67 = vector.broadcast %cst_29 : f32 to vector<8x16xf32>
      %68 = arith.select %66, %67, %51 : vector<8x16xi1>, vector<8x16xf32>
      %69 = arith.addf %48, %68 : vector<8x16xf32>
      %cst_30 = arith.constant 0.000000e+00 : f32
      %70 = vector.shape_cast %40 : vector<1x16xi1> to vector<1x16xi1>
      %71 = vector.broadcast %70 : vector<1x16xi1> to vector<8x16xi1>
      %72 = vector.broadcast %cst_30 : f32 to vector<8x16xf32>
      %73 = arith.select %71, %72, %54 : vector<8x16xi1>, vector<8x16xf32>
      %74 = arith.addf %69, %73 : vector<8x16xf32>
      %cst_31 = arith.constant 0.333333343 : f32
      %75 = vector.broadcast %cst_31 : f32 to vector<8x16xf32>
      %76 = arith.mulf %74, %75 : vector<8x16xf32>
      %77 = arith.addf %64, %76 : vector<8x16xf32>
      %c0_32 = arith.constant 0 : index
      %c0_33 = arith.constant 0 : index
      %78 = vector.load %arg4[%c0_32, %c0_33] : memref<8x8xf32, #tpu.memory_space<vmem>>, vector<8x8xf32>
      %cst_34 = arith.constant dense<0.000000e+00> : vector<8x16xf32>
      %79 = tpu.matmul %78, %77, %cst_34 {dimension_numbers = #tpu.dot_dimension_numbers<[1], [0], [0], [1], [0, 0, 1, 1], [], []>} : vector<8x8xf32>, vector<8x16xf32>, vector<8x16xf32> -> vector<8x16xf32>
      %c0_35 = arith.constant 0 : index
      %c0_36 = arith.constant 0 : index
      %80 = vector.load %arg5[%c0_35, %c0_36] : memref<8x1xf32, #tpu.memory_space<vmem>>, vector<8x1xf32>
      %81 = vector.broadcast %80 : vector<8x1xf32> to vector<8x16xf32>
      %82 = arith.addf %79, %81 : vector<8x16xf32>
      %cst_37 = arith.constant 0.000000e+00 : f32
      %83 = vector.broadcast %cst_37 : f32 to vector<8x16xf32>
      %84 = arith.maximumf %82, %83 : vector<8x16xf32>
      %c0_38 = arith.constant 0 : index
      %c0_39 = arith.constant 0 : index
      %85 = vector.load %arg6[%c0_38, %c0_39] : memref<16x8xf32, #tpu.memory_space<vmem>>, vector<16x8xf32>
      %cst_40 = arith.constant dense<0.000000e+00> : vector<16x16xf32>
      %86 = tpu.matmul %85, %84, %cst_40 {dimension_numbers = #tpu.dot_dimension_numbers<[1], [0], [0], [1], [0, 0, 1, 1], [], []>} : vector<16x8xf32>, vector<8x16xf32>, vector<16x16xf32> -> vector<16x16xf32>
      %c0_41 = arith.constant 0 : index
      %c0_42 = arith.constant 0 : index
      %87 = vector.load %arg7[%c0_41, %c0_42] : memref<16x1xf32, #tpu.memory_space<vmem>>, vector<16x1xf32>
      %88 = vector.broadcast %87 : vector<16x1xf32> to vector<16x16xf32>
      %89 = arith.addf %86, %88 : vector<16x16xf32>
      %90 = vector.extract_strided_slice %89 {offsets = [0, 0], sizes = [8, 16], strides = [1, 1]} : vector<16x16xf32> to vector<8x16xf32>
      %91 = math.tanh %90 : vector<8x16xf32>
      %92 = vector.extract_strided_slice %89 {offsets = [8, 0], sizes = [8, 16], strides = [1, 1]} : vector<16x16xf32> to vector<8x16xf32>
      %93 = math.exp %91 : vector<8x16xf32>
      %cst_43 = arith.constant dense<0.000000e+00> : vector<8xf32>
      %94 = vector.multi_reduction <add>, %93, %cst_43 [1] : vector<8x16xf32> to vector<8xf32>
      %95 = vector.shape_cast %94 : vector<8xf32> to vector<8x1xf32>
      %96 = tpu.reciprocal %95 {approx = true} : vector<8x1xf32> -> vector<8x1xf32>
      %97 = vector.broadcast %96 : vector<8x1xf32> to vector<8x16xf32>
      %98 = arith.mulf %93, %97 : vector<8x16xf32>
      %c0_44 = arith.constant 0 : index
      %c0_45 = arith.constant 0 : index
      %c0_46 = arith.constant 0 : index
      %99 = vector.load %arg8[%c0_44, %c0_45, %c0_46] : memref<1x8x16xf32, #tpu.memory_space<vmem>>, vector<1x8x16xf32>
      %100 = vector.shape_cast %99 : vector<1x8x16xf32> to vector<8x16xf32>
      %101 = vector.shape_cast %98 : vector<8x16xf32> to vector<1x8x16xf32>
      tpu.vector_store %arg8[%c0_44, %c0_45, %c0_46], %101 {strides = array<i32>} : memref<1x8x16xf32, #tpu.memory_space<vmem>>, vector<1x8x16xf32>,
      %c0_47 = arith.constant 0 : index
      %c0_48 = arith.constant 0 : index
      %c0_49 = arith.constant 0 : index
      %102 = vector.load %arg9[%c0_47, %c0_48, %c0_49] : memref<1x8x16xf32, #tpu.memory_space<vmem>>, vector<1x8x16xf32>
      %103 = vector.shape_cast %102 : vector<1x8x16xf32> to vector<8x16xf32>
      %104 = vector.shape_cast %92 : vector<8x16xf32> to vector<1x8x16xf32>
      tpu.vector_store %arg9[%c0_47, %c0_48, %c0_49], %104 {strides = array<i32>} : memref<1x8x16xf32, #tpu.memory_space<vmem>>, vector<1x8x16xf32>,
      %105 = arith.mulf %98, %92 : vector<8x16xf32>
      %cst_50 = arith.constant dense<0.000000e+00> : vector<8xf32>
      %106 = vector.multi_reduction <add>, %105, %cst_50 [1] : vector<8x16xf32> to vector<8xf32>
      %107 = vector.shape_cast %106 : vector<8xf32> to vector<8x1xf32>
      %c0_51 = arith.constant 0 : index
      %c0_52 = arith.constant 0 : index
      %c0_53 = arith.constant 0 : index
      %108 = vector.load %arg10[%c0_51, %c0_52, %c0_53] : memref<1x8x1xf32, #tpu.memory_space<vmem>>, vector<1x8x1xf32>
      %109 = vector.shape_cast %108 : vector<1x8x1xf32> to vector<8x1xf32>
      %110 = vector.shape_cast %107 : vector<8x1xf32> to vector<1x8x1xf32>
      tpu.vector_store %arg10[%c0_51, %c0_52, %c0_53], %110 {strides = array<i32>} : memref<1x8x1xf32, #tpu.memory_space<vmem>>, vector<1x8x1xf32>,
    } else {
    }
    return
  }
  func.func @transform_0(%arg0: i32, %arg1: i32) -> i32 {
    %c0_i32 = arith.constant 0 : i32
    %c0_i32_0 = arith.constant 0 : i32
    return %c0_i32 : i32
  }
  func.func @transform_1(%arg0: i32, %arg1: i32) -> (i32, i32, i32, i32) {
    %c0_i32 = arith.constant 0 : i32
    %c0_i32_0 = arith.constant 0 : i32
    %c0_i32_1 = arith.constant 0 : i32
    return %arg0, %c0_i32, %arg1, %c0_i32_0 : i32, i32, i32, i32
  }
  func.func @transform_2(%arg0: i32, %arg1: i32) -> (i32, i32) {
    %c0_i32 = arith.constant 0 : i32
    %c0_i32_0 = arith.constant 0 : i32
    %c0_i32_1 = arith.constant 0 : i32
    return %c0_i32, %c0_i32_0 : i32, i32
  }
  func.func @transform_3(%arg0: i32, %arg1: i32) -> (i32, i32) {
    %c0_i32 = arith.constant 0 : i32
    %c0_i32_0 = arith.constant 0 : i32
    %c0_i32_1 = arith.constant 0 : i32
    return %c0_i32, %c0_i32_0 : i32, i32
  }
  func.func @transform_4(%arg0: i32, %arg1: i32) -> (i32, i32) {
    %c0_i32 = arith.constant 0 : i32
    %c0_i32_0 = arith.constant 0 : i32
    %c0_i32_1 = arith.constant 0 : i32
    return %c0_i32, %c0_i32_0 : i32, i32
  }
  func.func @transform_5(%arg0: i32, %arg1: i32) -> (i32, i32) {
    %c0_i32 = arith.constant 0 : i32
    %c0_i32_0 = arith.constant 0 : i32
    %c0_i32_1 = arith.constant 0 : i32
    return %c0_i32, %c0_i32_0 : i32, i32
  }
  func.func @transform_6(%arg0: i32, %arg1: i32) -> (i32, i32, i32) {
    %c0_i32 = arith.constant 0 : i32
    %c0_i32_0 = arith.constant 0 : i32
    %c0_i32_1 = arith.constant 0 : i32
    return %arg0, %c0_i32, %c0_i32_0 : i32, i32, i32
  }
  func.func @transform_7(%arg0: i32, %arg1: i32) -> (i32, i32, i32) {
    %c0_i32 = arith.constant 0 : i32
    %c0_i32_0 = arith.constant 0 : i32
    %c0_i32_1 = arith.constant 0 : i32
    return %arg0, %c0_i32, %c0_i32_0 : i32, i32, i32
  }
  func.func @transform_8(%arg0: i32, %arg1: i32) -> (i32, i32, i32) {
    %c0_i32 = arith.constant 0 : i32
    %c0_i32_0 = arith.constant 0 : i32
    %c0_i32_1 = arith.constant 0 : i32
    return %arg0, %c0_i32, %c0_i32_0 : i32, i32, i32
  }
}

</mosaic_0001>

<bundles_post_ra>
// kernel: tpu_custom_call.1
= control target key start
LH: loop header
LB: loop body
LE: loop exit
PB: predicated region body
PF: predicated region fallthrough
CT: control target
= control target key end

     0   :  { %s1869_s0 = inlined_call_operand.<no memory space> [shape: f32[1], index: 0, kind: input, shape index: {}]   ;;  %s1870_s1 = inlined_call_operand.vmem [shape: f32[2,8,32,16], index: 1, kind: input, shape index: {}]   ;;  %s1871_s2 = inlined_call_operand.vmem [shape: f32[8,8], index: 2, kind: input, shape index: {}]   ;;  %s1872_s3 = inlined_call_operand.vmem [shape: f32[8,1], index: 3, kind: input, shape index: {}]   ;;  %s1873_s4 = inlined_call_operand.vmem [shape: f32[16,8], index: 4, kind: input, shape index: {}]   ;;  %s1874_s5 = inlined_call_operand.vmem [shape: f32[16,1], index: 5, kind: input, shape index: {}]   ;;  %s1875_s6 = inlined_call_operand.hbm [shape: f32[2,8,16], index: 6, kind: output, shape index: {0}]   ;;  %s1876_s7 = inlined_call_operand.hbm [shape: f32[2,8,16], index: 7, kind: output, shape index: {1}]   ;;  %s1877_s8 = inlined_call_operand.vmem [shape: f32[2,8,1], index: 8, kind: output, shape index: {2}]  }
   0x1   :  { %1882 = sst [smem:[#allocation15_spill]] %s1870_s1 }
   0x2   :  { %1883 = sst [smem:[#allocation16_spill]] %s1871_s2 }
   0x3   :  { %14 = sst [smem:[#allocation3]] %s1869_s0 }
   0x4   :  { %15 = vsyncpa [#allocation6], 0 }
   0x5   :  { %17 = vsyncpa [#allocation6 + $0x1], 0 }
   0x6   :  { %18 = vsyncpa [#allocation8], 0 }
   0x7   :  { %20 = vsyncpa [#allocation8 + $0x1], 0  ;;  %s1549_s29 = smov 0   ;;  %s1551_s30 = smov 0  }
   0x8   :  { %s1553_s9 = smov 0   ;;  %s1555_s10 = smov 0  }
   0x9   :  { %s1557_s11 = smov 0   ;;  %s1559_s12 = smov 0  }
   0xa   :  { %s1561_s13 = smov 0   ;;  %s1563_s14 = smov 0  }
   0xb   :  { %s1565_s0 = smov 0   ;;  %s1567_s15 = smov 0  }
   0xc LB: > { %1884 = sst [smem:[#allocation11_spill]] %s1487_s0  ;;  %s1124_s16 = sadd.s32 4294967295, %s1491_s15   ;;  %s1491_s15 = sphi %s1567_s15, %s26_s15   ;;  %s1487_s0 = sphi %s1565_s0, %s1896_s0   ;;  %s1483_s14 = sphi %s1563_s14, %s1903_s14   ;;  %s1479_s13 = sphi %s1561_s13, %s1894_s13   ;;  %s1475_s12 = sphi %s1559_s12, %s1902_s12   ;;  %s1471_s11 = sphi %s1557_s11, %s1901_s11   ;;  %s1467_s10 = sphi %s1555_s10, %s1900_s10   ;;  %s1463_s9 = sphi %s1553_s9, %s1899_s9   ;;  %s1459_s30 = sphi %s1551_s30, %s1898_s30   ;;  %s1455_s29 = sphi %s1549_s29, %s1897_s29  }
   0xd   : > { %s1125_s17 = sadd.s32 4294967294, %s1491_s15   ;;  %s35_s18 = sadd.s32 1, %s1483_s14 }
   0xe   : > { %s38_s19 = sadd.s32 1, %s1487_s0  ;;  %p36_p0 = scmp.ge.s32.totalorder %s35_s18, 2 }
   0xf   : > { %s68_s20 = sadd.s32 1, %s1471_s11  ;;  %p75_p1 = scmp.ne.s32.totalorder %s1471_s11, %s1467_s10 }
  0x10   : > { %p76_p2 = scmp.eq.s32.totalorder %s1491_s15, 0  ;;  %s1905_s18 = smov (%p36_p0, %s35_s18), 0 }
  0x11   : > { %1885 = sst [smem:[#allocation12_spill]] %s1905_s18  ;;  %s1907_s19 = smov (!%p36_p0, %s38_s19), %s1487_s0 }
  0x12   : > { %s64_s21 = ssub.s32 %s1483_s14, %s1905_s18  ;;  %p1612_p3 = por %p76_p2, %p75_p1 }
  0x13   : > { %p40_p4 = scmp.ge.s32.totalorder %s1907_s19, 2  ;;  %s178_s23 = sadd.s32 1, %s1463_s9 }
  0x14   : > { %p188_p5 = scmp.ne.s32.totalorder %s1463_s9, %s1459_s30  ;;  %p189_p6 = scmp.eq.s32.totalorder %s1124_s16, 3 }
  0x15   : > { %s1909_s19 = smov (%p40_p4, %s1907_s19), 0  ;;  %p194_p8 = scmp.ne.s32.totalorder %s1459_s30, %s1455_s29 }
  0x16   : > { %1887 = sst [smem:[#allocation13_spill]] %s1909_s19  ;;  %p1621_p7 = por %p189_p6, %p188_p5 }
  0x17   : > { %s63_s25 = ssub.s32 %s1487_s0, %s1909_s19  ;;  %p195_p9 = scmp.eq.s32.totalorder %s1125_s17, 3 }
  0x18   : > { %s65_s26 = sor.u32 %s64_s21, %s63_s25  ;;  %p176_p10 = scmp.eq.s32.totalorder %s63_s25, 0 }
  0x19   : > { %p66_p11 = scmp.eq.s32.totalorder %s65_s26, 0  ;;  %p1629_p12 = por %p195_p9, %p194_p8 }
  0x1a   : > { %s1634_s28 = scalar_select %p176_p10, %s1463_s9, %s178_s23  }
  0x1b   : > { %s1889_s27 = scalar_select %p1629_p12, 1, 0 }
  0x1c   : > { %s1637_s16 = scalar_select %p66_p11, %s1471_s11, %s68_s20  }
  0x1d   : > { %1890 = sst [smem:[#allocation14_spill]] %s1889_s27  ;;  %p1127_p13 = scmp.ge.s32.totalorder %s1491_s15, 4 }
  0x1f   : > { %278 = sbr.rel (%p1127_p13) target bundleno = 56 (0x38), region = 36 }
  0x26   : > { %281 = sbr.rel (!%p1612_p3) target bundleno = 56 (0x38), region = 40  ;;  %s283_s17 = sand.u32 (%p1612_p3), 1, %s1471_s11  }
  0x27   : > { %s1129_s21 = sshll.u32 (%p1612_p3), %s1483_s14, 1  ;;  %s1128_s25 = sshll.u32 (%p1612_p3), %s283_s17, 7 }
  0x28   : > { %s1130_s26 = sshll.u32 (%p1612_p3), %s1487_s0, 5  ;;  %s1891_s1 = sld [smem:[#allocation15_spill]] (%p1612_p3) }
  0x29   : > { %s288_s19 = sadd.s32 (%p1612_p3), %s1130_s26, %s1129_s21  ;;  %s285_s22 = scalar_lea.vmem (%p1612_p3), [#allocation4], %s1128_s25 }
  0x2a   : > { %s1131_s18 = sshll.u32 (%p1612_p3), %s288_s19, 3 }
  0x2e   : > { %s1648_s20 = scalar_lea.vmem %s1891_s1, %s1131_s18 }
  0x2f   : > { %v348_v0 = vld [vmem:[%s1648_s20] sm:$0xff]  ;;  %v350_v1 = vld [vmem:[%s1648_s20 + $0x8] sm:$0xff] }
  0x30   : > { %v352_v2 = vld [vmem:[%s1648_s20 + $0x20] sm:$0xff]  ;;  %349 = vst [vmem:[%s285_s22] sm:$0xff] %v348_v0  ;;  %351 = vst [vmem:[%s285_s22 + $0x8] sm:$0xff] %v350_v1  ;;  %v354_v3 = vld [vmem:[%s1648_s20 + $0x28] sm:$0xff] }
  0x31   : > { %353 = vst [vmem:[%s285_s22 + $0x10] sm:$0xff] %v352_v2  ;;  %v356_v4 = vld [vmem:[%s1648_s20 + $0x40] sm:$0xff]  ;;  %v358_v5 = vld [vmem:[%s1648_s20 + $0x48] sm:$0xff]  ;;  %355 = vst [vmem:[%s285_s22 + $0x18] sm:$0xff] %v354_v3 }
  0x32   : > { %357 = vst [vmem:[%s285_s22 + $0x20] sm:$0xff] %v356_v4  ;;  %359 = vst [vmem:[%s285_s22 + $0x28] sm:$0xff] %v358_v5  ;;  %v360_v6 = vld [vmem:[%s1648_s20 + $0x60] sm:$0xff]  ;;  %v362_v7 = vld [vmem:[%s1648_s20 + $0x68] sm:$0xff] }
  0x33   : > { %v364_v8 = vld [vmem:[%s1648_s20 + $0x80] sm:$0xff]  ;;  %361 = vst [vmem:[%s285_s22 + $0x30] sm:$0xff] %v360_v6  ;;  %363 = vst [vmem:[%s285_s22 + $0x38] sm:$0xff] %v362_v7  ;;  %v366_v9 = vld [vmem:[%s1648_s20 + $0x88] sm:$0xff] }
  0x34   : > { %365 = vst [vmem:[%s285_s22 + $0x40] sm:$0xff] %v364_v8  ;;  %v368_v10 = vld [vmem:[%s1648_s20 + $0xa0] sm:$0xff]  ;;  %v370_v11 = vld [vmem:[%s1648_s20 + $0xa8] sm:$0xff]  ;;  %367 = vst [vmem:[%s285_s22 + $0x48] sm:$0xff] %v366_v9 }
  0x35   : > { %369 = vst [vmem:[%s285_s22 + $0x50] sm:$0xff] %v368_v10  ;;  %371 = vst [vmem:[%s285_s22 + $0x58] sm:$0xff] %v370_v11  ;;  %v372_v12 = vld [vmem:[%s1648_s20 + $0xc0] sm:$0xff]  ;;  %v374_v13 = vld [vmem:[%s1648_s20 + $0xc8] sm:$0xff] }
  0x36   : > { %v376_v14 = vld [vmem:[%s1648_s20 + $0xe0] sm:$0xff]  ;;  %373 = vst [vmem:[%s285_s22 + $0x60] sm:$0xff] %v372_v12  ;;  %375 = vst [vmem:[%s285_s22 + $0x68] sm:$0xff] %v374_v13  ;;  %v378_v15 = vld [vmem:[%s1648_s20 + $0xe8] sm:$0xff] }
  0x37   : > { %377 = vst [vmem:[%s285_s22 + $0x70] sm:$0xff] %v376_v14  ;;  %379 = vst [vmem:[%s285_s22 + $0x78] sm:$0xff] %v378_v15 }
  0x38 PF: > { %p1132_p0 = scmp.ge.s32.totalorder %s1491_s15, 1  ;;  %p384_p1 = scmp.lt.s32.totalorder %s1491_s15, 5 }
  0x3a   : > { %p385_p2 = pnand %p1132_p0, %p384_p1 }
  0x3b   : > { %s391_s18 = sand.u32 (!%p385_p2), 1, %s1467_s10   ;;  %s1670_s19 = sand.u32 (!%p385_p2), 1, %s1459_s30  }
  0x3c   : > { %388 = sbr.rel (%p385_p2) target bundleno = 1148 (0x47c), region = 78  ;;  %s1133_s27 = sshll.u32 (!%p385_p2), %s391_s18, 7 }
  0x3d   : > { %s1134_s17 = sshll.u32 (!%p385_p2), %s1670_s19, 3  ;;  %p434_p3 = scmp.lt.s32.totalorder (!%p385_p2), %s1479_s13, 1 }
  0x3e   : > { %s1674_s21 = sld [smem:[#allocation3]] (!%p385_p2)  ;;  %s1682_s1 = scalar_lea.vmem (!%p385_p2), [#allocation4], %s1133_s27 }
  0x3f   : > { %s1684_s0 = scalar_lea.vmem (!%p385_p2), [#allocation5], %s1134_s17  ;;  %s1686_s10 = scalar_lea.vmem (!%p385_p2), [#allocation7], %s1134_s17 }
  0x40   : > { %p1137_p4 = scmp.ne.s32.totalorder (!%p385_p2), %s1475_s12, 0 }
  0x43   : > { %s435_s25 = scalar_select %p434_p3, %s1479_s13, 1 }
  0x44   : > { %442 = sbr.rel (%p1137_p4) target bundleno = 75 (0x4b), region = 86  ;;  %vm443_vm0 = vcmask (!%p1137_p4), 130048   ;;  %v1493_v16 = vmov (!%p1137_p4), 0.0  }
  0x45   : > { %s1136_s26 = sshll.u32 %s435_s25, 3  ;;  %444 = vst.msk [vmem:[#allocation2] sm:$0xff] (!%p1137_p4), %vm443_vm0, %v1493_v16 }
  0x46   : > { %s1680_s22 = scalar_lea.vmem %s1877_s8, %s1136_s26 }
  0x4b PF: > { %v445_v17 = vld [vmem:[%s1682_s1] sm:$0xff]  ;;  %v446_v18 = vld [vmem:[%s1682_s1 + $0x10] sm:$0xff]  ;;  %v1138_v31 = vld [vmem:[%s1682_s1 + $0x8] sm:$0xff]  ;;  %v1706_v48 = vstv %s1674_s21  ;;  %vm502_vm1 = vcmask 130048   ;;  %vm697_vm2 = vcmask 1041409   ;;  %vm699_vm3 = vcmask 1042434  }
  0x4c   : > { %v447_v19 = vld [vmem:[%s1682_s1 + $0x20] sm:$0xff]  ;;  %v448_v20 = vld [vmem:[%s1682_s1 + $0x30] sm:$0xff]  ;;  %v453_v23 = vmax.f32 %v445_v17, 1e-06  ;;  %v454_v25 = vmax.f32 %v446_v18, 1e-06 }
  0x4d   : > { %v449_v21 = vld [vmem:[%s1682_s1 + $0x40] sm:$0xff]  ;;  %v450_v22 = vld [vmem:[%s1682_s1 + $0x50] sm:$0xff]  ;;  %v455_v26 = vmax.f32 %v447_v19, 1e-06  ;;  %v456_v28 = vmax.f32 %v448_v20, 1e-06 }
  0x4e   : > { %v451_v24 = vld [vmem:[%s1682_s1 + $0x60] sm:$0xff]  ;;  %v452_v27 = vld [vmem:[%s1682_s1 + $0x70] sm:$0xff]  ;;  %v457_v29 = vmax.f32 %v449_v21, 1e-06  ;;  %1271 = vlog2.f32 %v453_v23  ;;  %v458_v30 = vmax.f32 %v450_v22, 1e-06 }
  0x4f   : > { %1273 = vlog2.f32 %v454_v25  ;;  %v459_v32 = vmax.f32 %v451_v24, 1e-06  ;;  %v1139_v33 = vld [vmem:[%s1682_s1 + $0x18] sm:$0xff]  ;;  %v460_v34 = vmax.f32 %v452_v27, 1e-06  ;;  %v1140_v35 = vld [vmem:[%s1682_s1 + $0x28] sm:$0xff] }
  0x50   : > { %1275 = vlog2.f32 %v455_v26  ;;  %v1141_v36 = vld [vmem:[%s1682_s1 + $0x38] sm:$0xff]  ;;  %v576_v37 = vmax.f32 %v1138_v31, 1e-06  ;;  %v1142_v38 = vld [vmem:[%s1682_s1 + $0x48] sm:$0xff]  ;;  %v577_v39 = vmax.f32 %v1139_v33, 1e-06 }
  0x51   : > { %1277 = vlog2.f32 %v456_v28  ;;  %v1143_v40 = vld [vmem:[%s1682_s1 + $0x58] sm:$0xff]  ;;  %v578_v41 = vmax.f32 %v1140_v35, 1e-06  ;;  %v1144_v42 = vld [vmem:[%s1682_s1 + $0x68] sm:$0xff]  ;;  %v579_v43 = vmax.f32 %v1141_v36, 1e-06 }
  0x52   : > { %1279 = vlog2.f32 %v457_v29  ;;  %v1145_v44 = vld [vmem:[%s1682_s1 + $0x78] sm:$0xff]  ;;  %v580_v45 = vmax.f32 %v1142_v38, 1e-06  ;;  %v581_v46 = vmax.f32 %v1143_v40, 1e-06  ;;  %vm701_vm4 = vcmask 1043459  }
  0x53   : > { %1281 = vlog2.f32 %v458_v30  ;;  %v582_v49 = vmax.f32 %v1144_v42, 1e-06  ;;  %v583_v52 = vmax.f32 %v1145_v44, 1e-06  ;;  %vm703_vm5 = vcmask 1044484   ;;  %p1146_p5 = scmp.ne.s32.totalorder %s1475_s12, 1 }
  0x54   : > { %1283 = vlog2.f32 %v459_v32  ;;  %vm705_vm6 = vcmask 1045509   ;;  %vm707_vm7 = vcmask 1046534   ;;  %vm709_vm8 = vcmask 1047559   ;;  %s1496_s12 = smov (!%p1146_p5), 1   ;;  %s1498_s25 = smov (!%p1146_p5), 127  }
  0x55   : > { %1285 = vlog2.f32 %v460_v34  ;;  %vm1495_vm9 = vmmov (!%p1146_p5), 0   ;;  %vm737_vm10 = vcmask (!%p1146_p5), 7168   ;;  %vm742_vm12 = vcmask (!%p1146_p5), 121856   ;;  %s1892_s2 = sld [smem:[#allocation16_spill]] (!%p1146_p5) }
  0x56   : > { %1287 = vlog2.f32 %v576_v37  ;;  %vm765_vm14 = vcmask (!%p1146_p5), 64512  }
  0x57   : > { %1289 = vlog2.f32 %v577_v39 }
  0x58   : > { %v1272_v47 = vpop.eup %1271  ;;  %1291 = vlog2.f32 %v578_v41 }
  0x59   : > { %v1274_v50 = vpop.eup %1273  ;;  %v462_v51 = vmul.f32 0.6931472, %v1272_v47  ;;  %1293 = vlog2.f32 %v579_v43 }
  0x5a   : > { %v1276_v53 = vpop.eup %1275  ;;  %v464_v54 = vmul.f32 0.6931472, %v1274_v50  ;;  %1295 = vlog2.f32 %v580_v45 }
  0x5b   : > { %v1278_v55 = vpop.eup %1277  ;;  %v466_v56 = vmul.f32 0.6931472, %v1276_v53  ;;  %v478_v57 = vmul.f32 %v1706_v48, %v462_v51  ;;  %1297 = vlog2.f32 %v581_v46 }
  0x5c   : > { %v1280_v58 = vpop.eup %1279  ;;  %v468_v59 = vmul.f32 0.6931472, %v1278_v55  ;;  %v479_v60 = vmul.f32 %v1706_v48, %v464_v54  ;;  %1299 = vlog2.f32 %v582_v49 }
  0x5d   : > { %v1282_v61 = vpop.eup %1281  ;;  %v470_v62 = vmul.f32 0.6931472, %v1280_v58  ;;  %v480_v63 = vmul.f32 %v1706_v48, %v466_v56  ;;  %v486_v0 = vmul.f32 1.442695, %v478_v57  ;;  %1301 = vlog2.f32 %v583_v52 }
  0x5e   : > { %v1284_v1 = vpop.eup %1283  ;;  %v472_v2 = vmul.f32 0.6931472, %v1282_v61  ;;  %v481_v3 = vmul.f32 %v1706_v48, %v468_v59  ;;  %v488_v4 = vmul.f32 1.442695, %v479_v60 }
  0x5f   : > { %v1286_v5 = vpop.eup %1285  ;;  %v474_v6 = vmul.f32 0.6931472, %v1284_v1  ;;  %v482_v7 = vmul.f32 %v1706_v48, %v470_v62  ;;  %1303 = vpow2.f32 %v486_v0  ;;  %v490_v8 = vmul.f32 1.442695, %v480_v63 }
  0x60   : > { %v1288_v9 = vpop.eup %1287  ;;  %v476_v10 = vmul.f32 0.6931472, %v1286_v5  ;;  %v483_v11 = vmul.f32 %v1706_v48, %v472_v2  ;;  %1305 = vpow2.f32 %v488_v4  ;;  %v492_v12 = vmul.f32 1.442695, %v481_v3 }
  0x61   : > { %v1290_v13 = vpop.eup %1289  ;;  %v484_v14 = vmul.f32 %v1706_v48, %v474_v6  ;;  %1307 = vpow2.f32 %v490_v8  ;;  %v494_v15 = vmul.f32 1.442695, %v482_v7  ;;  %v585_v16 = vmul.f32 0.6931472, %v1288_v9 }
  0x62   : > { %v1292_v17 = vpop.eup %1291  ;;  %v485_v18 = vmul.f32 %v1706_v48, %v476_v10  ;;  %1309 = vpow2.f32 %v492_v12  ;;  %v496_v19 = vmul.f32 1.442695, %v483_v11  ;;  %v587_v20 = vmul.f32 0.6931472, %v1290_v13 }
  0x63   : > { %v1294_v21 = vpop.eup %1293  ;;  %1311 = vpow2.f32 %v494_v15  ;;  %v498_v22 = vmul.f32 1.442695, %v484_v14  ;;  %v589_v23 = vmul.f32 0.6931472, %v1292_v17  ;;  %v600_v24 = vmul.f32 %v585_v16, %v1706_v48 }
  0x64   : > { %v1296_v25 = vpop.eup %1295  ;;  %1313 = vpow2.f32 %v496_v19  ;;  %v500_v26 = vmul.f32 1.442695, %v485_v18  ;;  %v591_v27 = vmul.f32 0.6931472, %v1294_v21  ;;  %v601_v28 = vmul.f32 %v587_v20, %v1706_v48 }
  0x65   : > { %v1298_v29 = vpop.eup %1297  ;;  %1315 = vpow2.f32 %v498_v22  ;;  %v593_v30 = vmul.f32 0.6931472, %v1296_v25  ;;  %v602_v31 = vmul.f32 %v589_v23, %v1706_v48  ;;  %v608_v32 = vmul.f32 1.442695, %v600_v24 }
  0x66   : > { %v1300_v33 = vpop.eup %1299  ;;  %1317 = vpow2.f32 %v500_v26  ;;  %v595_v34 = vmul.f32 0.6931472, %v1298_v29  ;;  %v603_v35 = vmul.f32 %v591_v27, %v1706_v48  ;;  %v610_v36 = vmul.f32 1.442695, %v601_v28 }
  0x67   : > { %v1302_v37 = vpop.eup %1301  ;;  %v597_v38 = vmul.f32 0.6931472, %v1300_v33  ;;  %v604_v39 = vmul.f32 %v593_v30, %v1706_v48  ;;  %1319 = vpow2.f32 %v608_v32  ;;  %v612_v40 = vmul.f32 1.442695, %v602_v31 }
  0x68   : > { %v599_v41 = vmul.f32 0.6931472, %v1302_v37  ;;  %v605_v42 = vmul.f32 %v595_v34, %v1706_v48  ;;  %1321 = vpow2.f32 %v610_v36  ;;  %v614_v43 = vmul.f32 1.442695, %v603_v35 }
  0x69   : > { %v1304_v44 = vpop.eup %1303  ;;  %v606_v45 = vmul.f32 %v597_v38, %v1706_v48  ;;  %1323 = vpow2.f32 %v612_v40  ;;  %v616_v46 = vmul.f32 1.442695, %v604_v39 }
  0x6a   : > { %v1306_v47 = vpop.eup %1305  ;;  %v503_v49 = vsel %vm502_vm1, %v1304_v44, 0.0  ;;  %v607_v50 = vmul.f32 %v599_v41, %v1706_v48  ;;  %1325 = vpow2.f32 %v614_v43  ;;  %v618_v51 = vmul.f32 1.442695, %v605_v42 }
  0x6b   : > { %v1308_v52 = vpop.eup %1307  ;;  %v504_v53 = vrot.slane %v503_v49, 4  ;;  %v510_v54 = vsel %vm502_vm1, %v1306_v47, 0.0  ;;  %1327 = vpow2.f32 %v616_v46  ;;  %v620_v55 = vmul.f32 1.442695, %v606_v45 }
  0x6c   : > { %v1310_v56 = vpop.eup %1309  ;;  %v511_v57 = vrot.slane %v510_v54, 4  ;;  %v517_v58 = vsel %vm502_vm1, %v1308_v52, 0.0  ;;  %1329 = vpow2.f32 %v618_v51  ;;  %v622_v59 = vmul.f32 1.442695, %v607_v50 }
  0x6d   : > { %v1312_v60 = vpop.eup %1311  ;;  %v505_v61 = vadd.f32 %v504_v53, %v503_v49  ;;  %v518_v62 = vrot.slane %v517_v58, 4  ;;  %v524_v63 = vsel %vm502_vm1, %v1310_v56, 0.0  ;;  %1331 = vpow2.f32 %v620_v55 }
  0x6e   : > { %v1314_v0 = vpop.eup %1313  ;;  %v512_v1 = vadd.f32 %v511_v57, %v510_v54  ;;  %v525_v2 = vrot.slane %v524_v63, 4  ;;  %v531_v3 = vsel %vm502_vm1, %v1312_v60, 0.0  ;;  %1333 = vpow2.f32 %v622_v59 }
  0x6f   : > { %v1316_v4 = vpop.eup %1315  ;;  %v506_v5 = vrot.slane %v505_v61, 2  ;;  %v519_v6 = vadd.f32 %v518_v62, %v517_v58  ;;  %v532_v7 = vrot.slane %v531_v3, 4  ;;  %v538_v8 = vsel %vm502_vm1, %v1314_v0, 0.0 }
  0x70   : > { %v1318_v9 = vpop.eup %1317  ;;  %v513_v10 = vrot.slane %v512_v1, 2  ;;  %v526_v11 = vadd.f32 %v525_v2, %v524_v63  ;;  %v539_v12 = vrot.slane %v538_v8, 4  ;;  %v545_v13 = vsel %vm502_vm1, %v1316_v4, 0.0 }
  0x71   : > { %v1320_v14 = vpop.eup %1319  ;;  %v507_v15 = vadd.f32 %v506_v5, %v505_v61  ;;  %v520_v16 = vrot.slane %v519_v6, 2  ;;  %v533_v17 = vadd.f32 %v532_v7, %v531_v3  ;;  %v546_v18 = vrot.slane %v545_v13, 4 }
  0x72   : > { %v1322_v19 = vpop.eup %1321  ;;  %v514_v20 = vadd.f32 %v513_v10, %v512_v1  ;;  %v527_v21 = vrot.slane %v526_v11, 2  ;;  %v540_v22 = vadd.f32 %v539_v12, %v538_v8  ;;  %v552_v23 = vsel %vm502_vm1, %v1318_v9, 0.0 }
  0x73   : > { %v1324_v24 = vpop.eup %1323  ;;  %v508_v25 = vrot.slane %v507_v15, 1  ;;  %v521_v26 = vadd.f32 %v520_v16, %v519_v6  ;;  %v534_v27 = vrot.slane %v533_v17, 2  ;;  %v547_v28 = vadd.f32 %v546_v18, %v545_v13 }
  0x74   : > { %v1326_v29 = vpop.eup %1325  ;;  %v515_v30 = vrot.slane %v514_v20, 1  ;;  %v528_v31 = vadd.f32 %v527_v21, %v526_v11  ;;  %v541_v32 = vrot.slane %v540_v22, 2  ;;  %v553_v33 = vrot.slane %v552_v23, 4 }
  0x75   : > { %v1328_v34 = vpop.eup %1327  ;;  %v522_v35 = vrot.slane %v521_v26, 1  ;;  %v535_v36 = vadd.f32 %v534_v27, %v533_v17  ;;  %v548_v37 = vrot.slane %v547_v28, 2  ;;  %v509_v43 = vadd.f32 %v508_v25, %v507_v15 }
  0x76   : > { %v1330_v38 = vpop.eup %1329  ;;  %v529_v39 = vrot.slane %v528_v31, 1  ;;  %v542_v40 = vadd.f32 %v541_v32, %v540_v22  ;;  %v554_v41 = vadd.f32 %v553_v33, %v552_v23  ;;  %v624_v46 = vsel %vm502_vm1, %v1320_v14, 0.0 }
  0x77   : > { %v1332_v42 = vpop.eup %1331  ;;  %v536_v44 = vrot.slane %v535_v36, 1  ;;  %v549_v45 = vadd.f32 %v548_v37, %v547_v28  ;;  %v516_v49 = vadd.f32 %v515_v30, %v514_v20  ;;  %v625_v52 = vrot.slane %v624_v46, 4 }
  0x78   : > { %v1334_v47 = vpop.eup %1333  ;;  %v543_v50 = vrot.slane %v542_v40, 1  ;;  %v555_v51 = vrot.slane %v554_v41, 2  ;;  %v523_v53 = vadd.f32 %v522_v35, %v521_v26  ;;  %v1733_v54 = vadd.f32 %v529_v39, %v528_v31 }
  0x79   : > { %v631_v55 = vsel %vm502_vm1, %v1322_v19, 0.0  ;;  %v638_v56 = vsel %vm502_vm1, %v1324_v24, 0.0  ;;  %v1737_v57 = vadd.f32 %v536_v44, %v535_v36  ;;  %v550_v58 = vrot.slane %v549_v45, 1 }
  0x7a   : > { %v626_v59 = vadd.f32 %v625_v52, %v624_v46  ;;  %v632_v60 = vrot.slane %v631_v55, 4  ;;  %v1739_v61 = vadd.f32 %v543_v50, %v542_v40  ;;  %v639_v62 = vrot.slane %v638_v56, 4 }
  0x7b   : > { %v645_v63 = vsel %vm502_vm1, %v1326_v29, 0.0  ;;  %v652_v0 = vsel %vm502_vm1, %v1328_v34, 0.0  ;;  %v556_v1 = vadd.f32 %v555_v51, %v554_v41  ;;  %v659_v7 = vsel %vm502_vm1, %v1330_v38, 0.0 }
  0x7c   : > { %v627_v2 = vrot.slane %v626_v59, 2  ;;  %v633_v3 = vadd.f32 %v632_v60, %v631_v55  ;;  %v646_v4 = vrot.slane %v645_v63, 4  ;;  %v640_v5 = vadd.f32 %v639_v62, %v638_v56 }
  0x7d   : > { %v653_v6 = vrot.slane %v652_v0, 4  ;;  %v666_v8 = vsel %vm502_vm1, %v1332_v42, 0.0  ;;  %v551_v9 = vadd.f32 %v550_v58, %v549_v45  ;;  %v660_v15 = vrot.slane %v659_v7, 4 }
  0x7e   : > { %v628_v10 = vadd.f32 %v627_v2, %v626_v59  ;;  %v634_v11 = vrot.slane %v633_v3, 2  ;;  %v647_v12 = vadd.f32 %v646_v4, %v645_v63  ;;  %v641_v13 = vrot.slane %v640_v5, 2 }
  0x7f   : > { %v654_v14 = vadd.f32 %v653_v6, %v652_v0  ;;  %v667_v16 = vrot.slane %v666_v8, 4  ;;  %v673_v20 = vsel %vm502_vm1, %v1334_v47, 0.0  ;;  %v661_v23 = vadd.f32 %v660_v15, %v659_v7 }
  0x80   : > { %v629_v17 = vrot.slane %v628_v10, 1  ;;  %v635_v18 = vadd.f32 %v634_v11, %v633_v3  ;;  %v648_v19 = vrot.slane %v647_v12, 2  ;;  %v642_v21 = vadd.f32 %v641_v13, %v640_v5  ;;  %v688_v5 = vld [vmem:[#allocation2] sm:$0xff] }
  0x81   : > { %v655_v22 = vrot.slane %v654_v14, 2  ;;  %v668_v24 = vadd.f32 %v667_v16, %v666_v8  ;;  %v674_v28 = vrot.slane %v673_v20, 4  ;;  %v662_v31 = vrot.slane %v661_v23, 2 }
  0x82   : > { %v630_v25 = vadd.f32 %v629_v17, %v628_v10  ;;  %v636_v26 = vrot.slane %v635_v18, 1  ;;  %v649_v27 = vadd.f32 %v648_v19, %v647_v12  ;;  %v643_v29 = vrot.slane %v642_v21, 1  ;;  %v842_v17 = vld [vmem:[%s1874_s5] sm:$0xff] (!%p1146_p5) }
  0x83   : > { %v656_v30 = vadd.f32 %v655_v22, %v654_v14  ;;  %v669_v32 = vrot.slane %v668_v24, 2  ;;  %v675_v35 = vadd.f32 %v674_v28, %v673_v20  ;;  %v663_v39 = vadd.f32 %v662_v31, %v661_v23 }
  0x84   : > { %v637_v33 = vadd.f32 %v636_v26, %v635_v18  ;;  %v650_v34 = vrot.slane %v649_v27, 1  ;;  %v680_v36 = vadd.f32 %v630_v25, %v509_v43  ;;  %v644_v37 = vadd.f32 %v643_v29, %v642_v21  ;;  %v843_v18 = vld [vmem:[%s1874_s5 + $0x8] sm:$0xff] (!%p1146_p5) }
  0x85   : > { %v657_v38 = vrot.slane %v656_v30, 1  ;;  %v670_v40 = vadd.f32 %v669_v32, %v668_v24  ;;  %v557_v41 = vrot.slane %v556_v1, 1  ;;  %v676_v44 = vrot.slane %v675_v35, 2 }
  0x86   : > { %v651_v42 = vadd.f32 %v650_v34, %v649_v27  ;;  %v681_v45 = vadd.f32 %v637_v33, %v516_v49  ;;  %v664_v47 = vrot.slane %v663_v39, 1  ;;  %v682_v51 = vadd.f32 %v644_v37, %v523_v53 }
  0x87   : > { %v658_v46 = vadd.f32 %v657_v38, %v656_v30  ;;  %v671_v50 = vrot.slane %v670_v40, 1  ;;  %v677_v52 = vadd.f32 %v676_v44, %v675_v35  ;;  %v558_v62 = vadd.f32 %v557_v41, %v556_v1  ;;  %v758_v35 = vld [vmem:[%s1892_s2] sm:$0xff] (!%p1146_p5) }
  0x88   : > { %v683_v55 = vadd.f32 %v651_v42, %v1733_v54  ;;  %v698_v56 = vsel %vm697_vm2, %v681_v45, %v680_v36  ;;  %v665_v58 = vadd.f32 %v664_v47, %v663_v39  ;;  %1337 = vrcp.f32 (!%p1146_p5), %v1706_v48  ;;  %v759_v48 = vld [vmem:[%s1872_s3] sm:$0xff] (!%p1146_p5)  ;;  %v841_v42 = vld [vmem:[%s1873_s4 + $0x8] sm:$0xff] (!%p1146_p5) }
  0x89   : > { %v672_v43 = vadd.f32 %v671_v50, %v670_v40  ;;  %v684_v59 = vadd.f32 %v658_v46, %v1737_v57  ;;  %v700_v60 = vsel %vm699_vm3, %v682_v51, %v698_v56  ;;  %v678_v63 = vrot.slane %v677_v52, 1  ;;  %v840_v36 = vld [vmem:[%s1873_s4] sm:$0xff] (!%p1146_p5) }
  0x8a   : > { %v702_v49 = vsel %vm701_vm4, %v683_v55, %v700_v60  ;;  %v685_v0 = vadd.f32 %v665_v58, %v1739_v61  ;;  %v1494_v14 = vmov (!%p1146_p5), 0.0   ;;  %v1497_v16 = vmov (!%p1146_p5), 0   ;;  %1168 = vmatprep.mubr.msk.f32.mxu1 (!%p1146_p5), %vm765_vm14, %v840_v36 }
  0x8b   : > { %v686_v53 = vadd.f32 %v672_v43, %v551_v9  ;;  %v704_v2 = vsel %vm703_vm5, %v684_v59, %v702_v49  ;;  %v679_v54 = vadd.f32 %v678_v63, %v677_v52  ;;  %1161 = vmatprep.subr.mxu0 (!%p1146_p5), %v1494_v14  ;;  %1163 = vmatprep.mubr.msk.f32.mxu0 (!%p1146_p5), %vm1495_vm9, %v1494_v14  ;;  %v721_v19 = vlaneseq (!%p1146_p5) }
  0x8c   : > { %v706_v3 = vsel %vm705_vm6, %v685_v0, %v704_v2  ;;  %717 = sbr.rel (%p1146_p5) target bundleno = 1100 (0x44c), region = 90  ;;  %1335 = vset.pattern.permute.xlu1 (!%p1146_p5), %v1497_v16  ;;  %1336 = vset.pattern.permute.xlu0 (!%p1146_p5), %v1497_v16 }
  0x8d   : > { %v687_v4 = vadd.f32 %v679_v54, %v558_v62  ;;  %v708_v6 = vsel %vm707_vm7, %v686_v53, %v706_v3  ;;  %762 = vperm.xlu1 (!%p1146_p5), %1335, %v759_v48   ;;  %v722_v20 = vand.u32 (!%p1146_p5), 127, %v721_v19 }
  0x8f   : > { %v710_v7 = vsel %vm709_vm8, %v687_v4, %v708_v6  ;;  %vm723_vm11 = vcmp.eq.s32.totalorder (!%p1146_p5), %v722_v20, 0  ;;  %vm724_vm13 = vcmp.eq.s32.totalorder (!%p1146_p5), %v722_v20, 15 }
  0x90   : > { %v712_v57 = vadd.f32 %v710_v7, %v688_v5 }
  0x91   : > { %846 = vperm.xlu1 (!%p1146_p5), %1335, %v842_v17  }
  0x92   : > { %713 = vst.msk [vmem:[#allocation2] sm:$0xff] %vm502_vm1, %v712_v57  ;;  %v1338_v1 = vpop.eup (!%p1146_p5), %1337 }
  0x93   : > { %1171 = vpush %v1338_v1 }
  0x95   : > { %851 = vperm.xlu1 %1335, %v843_v18  }
  0x99   : > { %v725_v61 = vld [vmem:[#allocation2] sm:$0xff] }
  0x9a   : > { %v726_v8 = vmul.f32 0.03125, %v725_v61 }
  0x9c   : > { %1339 = vlog2.f32 %v726_v8 }
  0xa6   : > { %v1340_v9 = vpop.eup %1339 }
  0xa7   : > { %v728_v10 = vmul.f32 0.6931472, %v1340_v9 }
  0xc4   : > { %s1172_s1 = spop %1171 }
  0xc5   : > { %v729_v11 = vstv %s1172_s1 }
  0xc6   : > { %v730_v12 = vmul.f32 %v729_v11, %v728_v10 }
  0xc8   : > { %v731_v13 = vmul.f32 1.442695, %v730_v12 }
  0xca   : > { %1341 = vpow2.f32 %v731_v13 }
  0xd4   : > { %v1342_v15 = vpop.eup %1341 }
  0xd5   : > { %734 = vrot.lane.b32.xlu0 %v1342_v15, %s1496_s12 }
  0xd9   : > { %739 = vrot.lane.b32.xlu0 %v1342_v15, %s1498_s25 }
 0x10c   : > { %v763_v37 = vpop.permute.xlu1 %762 }
 0x110   : > { %v847_v44 = vpop.permute.xlu1 %846 }
 0x114   : > { %v852_v45 = vpop.permute.xlu1 %851 }
 0x147   : > { %v735_v21 = vpop.permute.xlu0 %734 }
 0x148   : > { %v738_v22 = vsel %vm737_vm10, %v1342_v15, %v735_v21 }
 0x149   : > { %v752_v23 = vsel %vm723_vm11, 0.0, %v738_v22  ;;  %v746_v24 = vsel %vm723_vm11, -inf, %v738_v22 }
 0x14a   : > { %v753_v26 = vadd.f32 %v1342_v15, %v752_v23  ;;  %v747_v30 = vmax.f32 %v1342_v15, %v746_v24 }
 0x14b   : > { %v740_v25 = vpop.permute.xlu0 %739 }
 0x14c   : > { %v743_v27 = vsel %vm742_vm12, %v740_v25, %v1342_v15 }
 0x14d   : > { %v750_v28 = vsel %vm724_vm13, -inf, %v743_v27  ;;  %v754_v29 = vsel %vm724_vm13, 0.0, %v743_v27 }
 0x14e   : > { %v755_v31 = vadd.f32 %v754_v29, %v753_v26  ;;  %v751_v32 = vmax.f32 %v747_v30, %v750_v28 }
 0x150   : > { %v756_v33 = vmul.f32 0.33333334, %v755_v31 }
 0x152   : > { %v757_v34 = vadd.f32 %v756_v33, %v751_v32 }
 0x154   : > { %1162 = vmatpush3.msra.mxu0 %v757_v34 }
 0x155   : > { %1164 = vmatmul.mubr.msk.f32.vlgmr.msra.gmra.mrb[0].mxu0 %vm765_vm14, %v758_v35 }
 0x228   : > { %v835_v38 = vpop.f32.mrb[0].mxu0 }
 0x229   : > { %v836_v39 = vadd.f32 %v835_v38, %v763_v37  ;;  %v1165_v40 = vpop.f32.mrb[1].mxu0 }
 0x22b   : > { %v839_v41 = vmax.f32 %v836_v39, 0.0 }
 0x22d   : > { %1166 = vmatprep.subr.mxu1 %v839_v41 }
 0x22e   : > { %1167 = vmatpush3.msra.mxu1 %v839_v41 }
 0x22f   : > { %1169 = vmatmul.mubr.msk.f32.vlgmr.msra.gmra.mrb[0].mxu1 %vm765_vm14, %v841_v42 }
 0x302   : > { %v1170_v46 = vpop.f32.mrb[0].mxu1 }
 0x303   : > { %v932_v47 = vadd.f32 %v1170_v46, %v852_v45  ;;  %v926_v50 = vpop.f32.mrb[1].mxu1 }
 0x304   : > { %v927_v51 = vadd.f32 %v926_v50, %v847_v44 }
 0x305   : > { %944 = vst.msk [vmem:[%s1686_s10] sm:$0xff] %vm502_vm1, %v932_v47 }
 0x306   : > { %1343 = vtanh.f32 %v927_v51 }
 0x310   : > { %v1344_v52 = vpop.eup %1343 }
 0x311   : > { %v936_v55 = vmul.f32 1.442695, %v1344_v52 }
 0x313   : > { %1345 = vpow2.f32 %v936_v55 }
 0x31d   : > { %v1346_v56 = vpop.eup %1345 }
 0x31e   : > { %v938_v58 = vsel %vm502_vm1, %v1346_v56, 0.0 }
 0x31f   : > { %939 = vadd.xlane.f32.xlu0 %v938_v58 }
 0x3ac   : > { %v940_v43 = vpop.xlane.xlu0 %939 }
 0x3ad   : > { %1347 = vrcp.f32 %v940_v43 }
 0x3b7   : > { %v1348_v59 = vpop.eup %1347 }
 0x3b8   : > { %v942_v60 = vmul.f32 %v1348_v59, %v1346_v56 }
 0x3ba   : > { %v945_v62 = vmul.f32 %v942_v60, %v932_v47  ;;  %943 = vst.msk [vmem:[%s1684_s0] sm:$0xff] %vm502_vm1, %v942_v60 }
 0x3bc   : > { %v946_v63 = vsel %vm502_vm1, %v945_v62, 0.0 }
 0x3bd   : > { %947 = vadd.xlane.f32.xlu1 %v946_v63 }
 0x44a   : > { %v948_v49 = vpop.xlane.xlu1 %947 }
 0x44b   : > { %949 = vst.msk [vmem:[%s1680_s22] sm:$0xff] %vm737_vm10, %v948_v49 }
 0x44c PF: > { %s1152_s21 = sshll.u32 %s1479_s13, 7  ;;  %s973_s20 = sshll.u32 %s1684_s0, 4  ;;  %s974_s20 = int_to_ptr.vmem [resolvable:$true] %s973_s20 }
 0x44d   : > { %s1788_s23 = scalar_lea.hbm %s1875_s6, %s1152_s21  ;;  %s951_s1 = scalar_lea.sflag [#allocation6], %s1670_s19 }
 0x44e   : > { %s1349_s12 = scalar_lea.vmem %s974_s20, 128  ;;  %s1499_s22 = smov [#allocation5]  }
 0x44f   : > { %p1350_p6 = scmp.ne.s32.totalorder %s974_s20, %s1349_s12  ;;  %s1353_s18 = sshll.u32 %s1499_s22, 4  ;;  %s1354_s18 = int_to_ptr.vmem [resolvable:$false] %s1353_s18 }
 0x450   : > { %s1355_s27 = scalar_lea.vmem %s1354_s18, 256  ;;  %p1356_p10 = scmp.lt.s32.totalorder %s974_s20, %s1354_s18 }
 0x451   : > { %p1351_p8 = pnand %p1350_p6, %p1621_p7  ;;  %p1357_p11 = scmp.lt.s32.totalorder %s1355_s27, %s1349_s12 }
 0x453   : > { %p1352_p9 = pneg %p1351_p8  ;;  %p1358_p13 = por %p1357_p11, %p1356_p10 }
 0x455   : > { %p1359_p0 = pnand %p1358_p13, %p1352_p9 }
 0x457   : > { %1362 = shalt.err (!%p1359_p0)
}
 0x458   : > { %s1363_s0 = scalar_lea.hbm %s1788_s23, 128  ;;  %s1367_s26 = scalar_lea.hbm %s1875_s6, 256 }
 0x459   : > { %p1364_p1 = scmp.ne.s32.totalorder %s1788_s23, %s1363_s0  ;;  %p1368_p4 = scmp.lt.u32.totalorder %s1788_s23, %s1875_s6 }
 0x45a   : > { %p1369_p5 = scmp.lt.u32.totalorder %s1367_s26, %s1363_s0  ;;  %p1371_p8 = scmp.lt.u32.totalorder %s1363_s0, %s1788_s23 }
 0x45b   : > { %p1365_p2 = pnand %p1364_p1, %p1621_p7 }
 0x45c   : > { %p1370_p6 = por %p1369_p5, %p1368_p4 }
 0x45d   : > { %p1366_p3 = pneg %p1365_p2 }
 0x45e   : > { %p1372_p9 = por %p1371_p8, %p1370_p6 }
 0x460   : > { %p1373_p10 = pnand %p1372_p9, %p1366_p3 }
 0x462   : > { %1376 = shalt.err (!%p1373_p10)
}
 0x463   : > { %1173 = dma.vmem_to_hbm [thread:$0]  (%p1621_p7), %s974_s20, 128, %s1788_s23, %s951_s1  }
 0x464   : > { %s1814_s17 = scalar_lea.hbm %s1876_s7, %s1152_s21  ;;  %s986_s25 = sshll.u32 %s1686_s10, 4  ;;  %s987_s25 = int_to_ptr.vmem [resolvable:$true] %s986_s25 }
 0x465   : > { %s956_s0 = scalar_lea.sflag [#allocation8], %s1670_s19  ;;  %s1377_s26 = scalar_lea.vmem %s987_s25, 128 }
 0x466   : > { %p1378_p11 = scmp.ne.s32.totalorder %s987_s25, %s1377_s26  ;;  %s1500_s22 = smov [#allocation7]  }
 0x467   : > { %s1381_s18 = sshll.u32 %s1500_s22, 4  ;;  %s1382_s18 = int_to_ptr.vmem [resolvable:$false] %s1381_s18 }
 0x468   : > { %p1379_p13 = pnand %p1378_p11, %p1621_p7  ;;  %s1383_s2 = scalar_lea.vmem %s1382_s18, 256 }
 0x469   : > { %p1384_p1 = scmp.lt.s32.totalorder %s987_s25, %s1382_s18  ;;  %p1385_p2 = scmp.lt.s32.totalorder %s1383_s2, %s1377_s26 }
 0x46a   : > { %p1380_p0 = pneg %p1379_p13 }
 0x46b   : > { %p1386_p3 = por %p1385_p2, %p1384_p1 }
 0x46d   : > { %p1387_p4 = pnand %p1386_p3, %p1380_p0 }
 0x46f   : > { %1390 = shalt.err (!%p1387_p4)
}
 0x470   : > { %s1391_s13 = scalar_lea.hbm %s1814_s17, 128  ;;  %s1395_s21 = scalar_lea.hbm %s1876_s7, 256 }
 0x471   : > { %p1392_p5 = scmp.ne.s32.totalorder %s1814_s17, %s1391_s13  ;;  %p1396_p9 = scmp.lt.u32.totalorder %s1814_s17, %s1876_s7 }
 0x472   : > { %p1397_p10 = scmp.lt.u32.totalorder %s1395_s21, %s1391_s13  ;;  %p1399_p13 = scmp.lt.u32.totalorder %s1391_s13, %s1814_s17 }
 0x473   : > { %p1393_p6 = pnand %p1392_p5, %p1621_p7 }
 0x474   : > { %p1398_p11 = por %p1397_p10, %p1396_p9 }
 0x475   : > { %p1394_p8 = pneg %p1393_p6 }
 0x476   : > { %p1400_p0 = por %p1399_p13, %p1398_p11 }
 0x478   : > { %p1401_p1 = pnand %p1400_p0, %p1394_p8 }
 0x47a   : > { %1404 = shalt.err (!%p1401_p1)
}
 0x47b   : > { %1174 = dma.vmem_to_hbm [thread:$0]  (%p1621_p7), %s987_s25, 128, %s1814_s17, %s956_s0  }
 0x47c PF: > { %p1184_p2 = scmp.ge.s32.totalorder %s1491_s15, 2  ;;  %s1001_s1 = sand.u32 1, %s1455_s29  }
 0x47d   : > { %s1002_s12 = scalar_lea.sflag [#allocation6], %s1001_s1 }
 0x47e   : > { %p1178_p3 = pnand %p1184_p2, %p1629_p12 }
 0x480   : > { %1446 = dma.done.wait (!%p1178_p3), %s1002_s12, 128  }
 0x481   : > { %1448 = vsyncadd (!%p1178_p3), %s1002_s12, 4294967168  ;;  %s1011_s27 = scalar_lea.sflag [#allocation8], %s1001_s1 }
 0x482   : > { %1450 = dma.done.wait (!%p1178_p3), %s1011_s27, 128  }
 0x483   : > { %1452 = vsyncadd (!%p1178_p3), %s1011_s27, 4294967168  ;;  %s26_s15 = sadd.s32 1, %s1491_s15   ;;  %s1894_s13 = sld [smem:[#allocation11_spill]] }
 0x484   : > { %p23_p4 = scmp.ge.s32.totalorder %s26_s15, 6   ;;  %s1895_s24 = sld [smem:[#allocation12_spill]] }
 0x485   : > { %s1896_s0 = sld [smem:[#allocation13_spill]]  ;;  %s1897_s29 = smov %s1459_s30 }
 0x486   : > { %s1898_s30 = smov %s1463_s9  ;;  %s1899_s9 = smov %s1634_s28 }
 0x487   : > { %s1900_s10 = smov %s1471_s11  ;;  %s1901_s11 = smov %s1637_s16 }
 0x488   : > { %s1902_s12 = smov %s1483_s14  ;;  %25 = sbr.rel (!%p23_p4) target bundleno = 12 (0xc), region = 160 }
 0x48a   : > { %s1903_s14 = smov %s1895_s24 }
 0x48f   :  { %1023 = vsyncpa [#allocation6], 1 }
 0x490   :  { %1025 = vsyncpa [#allocation6 + $0x1], 1 }
 0x491   :  { %1026 = vsyncpa [#allocation8], 1 }
 0x492   :  { %1028 = vsyncpa [#allocation8 + $0x1], 1 }

</bundles_post_ra>
